<compile_context>
chip_gen: v5e
topology: v5e:2x2
jax: 0.10.0
libtpu: 0.0.40
codegen_flags: <defaults>
</compile_context>

<pallas_src>
import functools
import math

import jax
import jax.numpy as jnp
from jax.experimental import pallas as pl
from jax.experimental.pallas import tpu as pltpu

NEG_BIG = -9e15                     # matches pyGAT's zero_vec = -9e15
VMEM_LIMIT = 32 * 1024 * 1024       # explicit scoped-VMEM limit (safe on v5e..v7x)


def _ceil_to(a, b):
    return ((a + b - 1) // b) * b


def _newton_recip(x):
    """EUP approximate reciprocal refined to ~f32 accuracy with one Newton step."""
    r = pl.reciprocal(x, approx=True)
    return r * (2.0 - x * r)


# --------------------------------------------------------------------------
# Kernel 1: fused-head projection  Wh_all = x @ W_all
# --------------------------------------------------------------------------
def _proj_kernel(x_ref, w_ref, wh_ref):
    wh_ref[...] = jnp.dot(x_ref[...], w_ref[...],
                          preferred_element_type=jnp.float32)


# --------------------------------------------------------------------------
# Kernel 2: tiled multi-head attention with online (flash-style) softmax.
#   grid = (num_row_blocks, num_col_blocks); col axis is the reduction axis.
# --------------------------------------------------------------------------
def _gat_attn_kernel(whq_ref, whk_ref, adj_ref, a1_ref, a2_ref, out_ref,
                     m_sc, l_sc, acc_sc, *, nheads, fout, alpha,
                     act_elu, act_final):
    kj = pl.program_id(1)
    nk = pl.num_programs(1)

    @pl.when(kj == 0)
    def _():
        m_sc[...] = jnp.full_like(m_sc, -jnp.inf)
        l_sc[...] = jnp.zeros_like(l_sc)
        acc_sc[...] = jnp.zeros_like(acc_sc)

    edge = adj_ref[...] != 0                       # (TQ, TK) bool from uint8
    whq = whq_ref[...]                             # (TQ, H*F)  query-row tile
    whk = whk_ref[...]                             # (TK, H*F)  key/value col tile
    a1 = a1_ref[...]                               # (H, F)
    a2 = a2_ref[...]                               # (H, F)

    for h in range(nheads):                        # static unroll over heads
        lo, hi = h * fout, (h + 1) * fout
        whq_h = whq[:, lo:hi]                      # (TQ, F)
        whk_h = whk[:, lo:hi]                      # (TK, F)

        # attention logits via VPU reductions (no lane-width-1 MXU matvec)
        f1 = jnp.sum(whq_h * a1[h][None, :], axis=-1, keepdims=True)   # (TQ, 1)
        f2 = jnp.sum(whk_h * a2[h][None, :], axis=-1, keepdims=True)   # (TK, 1)
        e = f1 + jnp.transpose(f2)                                     # (TQ, TK)
        e = jnp.where(e > 0, e, alpha * e)          # LeakyReLU(alpha)
        e = jnp.where(edge, e, NEG_BIG)             # mask non-edges

        # online softmax accumulation over column blocks
        m_prev = m_sc[h]                                               # (TQ, 1)
        m_new = jnp.maximum(m_prev, jnp.max(e, axis=1, keepdims=True))
        scale = jnp.exp(m_prev - m_new)
        p = jnp.exp(e - m_new)                                         # (TQ, TK)
        l_sc[h] = scale * l_sc[h] + jnp.sum(p, axis=1, keepdims=True)
        acc_sc[h] = scale * acc_sc[h] + jnp.dot(
            p, whk_h, preferred_element_type=jnp.float32)
        m_sc[h] = m_new

    @pl.when(kj == nk - 1)
    def _():
        outs = []
        for h in range(nheads):
            inv = _newton_recip(l_sc[h])            # (TQ, 1)
            outs.append(acc_sc[h] * inv)            # (TQ, F)
        o = outs[0] if nheads == 1 else jnp.concatenate(outs, axis=-1)
        if act_elu:                                 # per-head ELU (layer 1)
            o = jnp.where(o > 0, o, jnp.exp(o) - 1.0)
        if act_final:                               # outer F.elu + log_softmax
            o = jnp.where(o > 0, o, jnp.exp(o) - 1.0)
            mm = jnp.max(o, axis=1, keepdims=True)
            z = o - mm
            o = z - jnp.log(jnp.sum(jnp.exp(z), axis=1, keepdims=True))
        out_ref[...] = o.astype(out_ref.dtype)      # single lane-dense store


# --------------------------------------------------------------------------
# Layer wrapper
# --------------------------------------------------------------------------
def _choose_tiles(n, tq, tk):
    if tq is None and tk is None:
        if n <= 512:
            return n, n, n                          # full-array blocks, no padding
        tq, tk = 256, 512
    else:
        tq = 256 if tq is None else tq
        tk = 512 if tk is None else tk
    assert tq % 32 == 0 and tk % 128 == 0, "tiles must be (32,128)-aligned"
    n_pad = _ceil_to(n, math.lcm(tq, tk))
    return tq, tk, n_pad


def gat_multihead_layer(x, adj_u8, W, a1, a2, *, alpha, concat, final=False,
                        tq=None, tk=None):
    """One GATMutiHeadAttLayer. Returns (N, nheads*F_out) if concat else (N, F_out)."""
    nheads, fin, fout = W.shape
    N = x.shape[0]
    hf = nheads * fout

    # weights stacked over heads along the lane axis (matches torch.cat(dim=1))
    w_all = jnp.transpose(W, (1, 0, 2)).reshape(fin, hf)
    a1 = a1.reshape(nheads, fout)
    a2 = a2.reshape(nheads, fout)

    tq, tk, n_pad = _choose_tiles(N, tq, tk)
    if n_pad != N:
        x = jnp.pad(x, ((0, n_pad - N), (0, 0)))
        adj_u8 = jnp.pad(adj_u8, ((0, n_pad - N), (0, n_pad - N)))

    # ---- projection: Wh_all = x @ W_all (computed once, hoisted) ----
    wh = pl.pallas_call(
        _proj_kernel,
        out_shape=jax.ShapeDtypeStruct((n_pad, hf), jnp.float32),
        grid=(n_pad // tq,),
        in_specs=[pl.BlockSpec((tq, fin), lambda i: (i, 0)),
                  pl.BlockSpec((fin, hf), lambda i: (0, 0))],
        out_specs=pl.BlockSpec((tq, hf), lambda i: (i, 0)),
        compiler_params=pltpu.CompilerParams(
            dimension_semantics=("parallel",),
            vmem_limit_bytes=VMEM_LIMIT),
    )(x, w_all)

    # ---- tiled attention with online softmax, all heads fused ----
    act_final = final and (concat or nheads == 1)
    kernel = functools.partial(_gat_attn_kernel, nheads=nheads, fout=fout,
                               alpha=alpha, act_elu=concat, act_final=act_final)
    out = pl.pallas_call(
        kernel,
        out_shape=jax.ShapeDtypeStruct((n_pad, hf), jnp.float32),
        grid=(n_pad // tq, n_pad // tk),
        in_specs=[
            pl.BlockSpec((tq, hf), lambda qi, kj: (qi, 0)),    # Wh rows (queries)
            pl.BlockSpec((tk, hf), lambda qi, kj: (kj, 0)),    # Wh cols (keys/vals)
            pl.BlockSpec((tq, tk), lambda qi, kj: (qi, kj)),   # adjacency tile (u8)
            pl.BlockSpec((nheads, fout), lambda qi, kj: (0, 0)),
            pl.BlockSpec((nheads, fout), lambda qi, kj: (0, 0)),
        ],
        out_specs=pl.BlockSpec((tq, hf), lambda qi, kj: (qi, 0)),
        scratch_shapes=[
            pltpu.VMEM((nheads, tq, 1), jnp.float32),      # running max
            pltpu.VMEM((nheads, tq, 1), jnp.float32),      # running denom
            pltpu.VMEM((nheads, tq, fout), jnp.float32),   # running numerator
        ],
        compiler_params=pltpu.CompilerParams(
            dimension_semantics=("parallel", "arbitrary"),
            vmem_limit_bytes=VMEM_LIMIT),
    )(wh, wh, adj_u8, a1, a2)

    out = out[:N]
    if concat:
        return out                                  # already lane-concatenated
    if nheads == 1:
        return out                                  # mean over 1 head == identity
    # concat=False with multiple heads: average heads FIRST, then activation
    out = out.reshape(N, nheads, fout).mean(axis=1)
    if final:
        out = jax.nn.log_softmax(jax.nn.elu(out), axis=1)
    return out


def gat_forward(x, adj, params, *, alpha, tq=None, tk=None):
    # adjacency is only ever used as a boolean mask -> store/stream it as uint8
    adj_u8 = (adj > 0).astype(jnp.uint8)
    h = gat_multihead_layer(x, adj_u8, params["W1"], params["a1_1"], params["a2_1"],
                            alpha=alpha, concat=True, tq=tq, tk=tk)
    out = gat_multihead_layer(h, adj_u8, params["W2"], params["a1_2"], params["a2_2"],
                              alpha=alpha, concat=False, final=True, tq=tq, tk=tk)
    return out


# ---------------- pure-JAX reference for verification ----------------
def _gat_layer_ref(x, adj, W, a1, a2, alpha, concat):
    outs = []
    for h in range(W.shape[0]):
        wh = x @ W[h]
        e = wh @ a1[h] + (wh @ a2[h]).T
        e = jnp.where(e > 0, e, alpha * e)
        e = jnp.where(adj > 0, e, NEG_BIG)
        att = jax.nn.softmax(e, axis=1)
        hp = att @ wh
        if concat:
            hp = jax.nn.elu(hp)
        outs.append(hp)
    if concat:
        return jnp.concatenate(outs, axis=1)
    return jnp.mean(jnp.stack(outs), axis=0)


def _gat_ref(x, adj, params, alpha):
    h = _gat_layer_ref(x, adj, params["W1"], params["a1_1"], params["a2_1"],
                       alpha, True)
    o = _gat_layer_ref(h, adj, params["W2"], params["a1_2"], params["a2_2"],
                       alpha, False)
    return jax.nn.log_softmax(jax.nn.elu(o), axis=1)


# ---------------- deterministic parameter init ----------------
def _xavier_uniform(key, shape, gain=1.414):
    fan_in, fan_out = shape[-2], shape[-1]
    limit = gain * jnp.sqrt(6.0 / (fan_in + fan_out))
    return jax.random.uniform(key, shape, jnp.float32, -limit, limit)


def init_gat_params(key, nfeat, nhid, nclass, nheads):
    k = jax.random.split(key, 4)
    W1 = _xavier_uniform(k[0], (nheads, nfeat, nhid))
    a_1 = _xavier_uniform(k[1], (nheads, 2 * nhid, 1))
    W2 = _xavier_uniform(k[2], (1, nhid * nheads, nclass))
    a_2 = _xavier_uniform(k[3], (1, 2 * nclass, 1))
    return {
        "W1": W1, "a1_1": a_1[:, :nhid, :], "a2_1": a_1[:, nhid:, :],
        "W2": W2, "a1_2": a_2[:, :nclass, :], "a2_2": a_2[:, nclass:, :],
    }


def _make_graph(kx, kadj, n, nfeat, p_edge):
    x = jax.random.normal(kx, (n, nfeat), jnp.float32)
    adj = (jax.random.uniform(kadj, (n, n)) > p_edge).astype(jnp.float32)
    adj = jnp.maximum(adj, adj.T)                              # symmetric
    adj = jnp.maximum(adj, jnp.eye(n, dtype=jnp.float32))      # self-loops
    return x, adj


if __name__ == "__main__":
    alpha = 0.2
    key = jax.random.PRNGKey(0)

    # --- case 1: small graph, full-block (single grid step) path ---
    N, nfeat, nhid, nclass, nheads = 16, 8, 8, 4, 2
    kx, kadj, kp, key = jax.random.split(key, 4)
    x, adj = _make_graph(kx, kadj, N, nfeat, 0.6)
    params = init_gat_params(kp, nfeat, nhid, nclass, nheads)

    out = jax.block_until_ready(gat_forward(x, adj, params, alpha=alpha))
    ref = _gat_ref(x, adj, params, alpha)
    assert out.shape == (N, nclass)
    assert not bool(jnp.any(jnp.isnan(out)))
    assert bool(jnp.allclose(out, ref, atol=1e-4, rtol=1e-4))
    assert bool(jnp.allclose(jnp.sum(jnp.exp(out), axis=1), 1.0, atol=1e-4))

    # --- case 2: tiled online-softmax path (row/col blocks + padding) ---
    N2, nfeat2, nhid2, nclass2, nheads2 = 200, 12, 8, 6, 4
    kx2, kadj2, kp2, key = jax.random.split(key, 4)
    x2, adj2 = _make_graph(kx2, kadj2, N2, nfeat2, 0.9)
    params2 = init_gat_params(kp2, nfeat2, nhid2, nclass2, nheads2)

    out2 = jax.block_until_ready(
        gat_forward(x2, adj2, params2, alpha=alpha, tq=64, tk=128))
    ref2 = _gat_ref(x2, adj2, params2, alpha)
    assert out2.shape == (N2, nclass2)
    assert not bool(jnp.any(jnp.isnan(out2)))
    assert bool(jnp.allclose(out2, ref2, atol=1e-4, rtol=1e-4))

    print("KERNEL_OK")
</pallas_src>

<mosaic_0001>
module attributes {stable_mosaic.version = 11 : i64} {
  func.func @_proj_kernel(%arg0: i32, %arg1: memref<16x8xf32, #tpu.memory_space<vmem>>, %arg2: memref<8x16xf32, #tpu.memory_space<vmem>>, %arg3: memref<16x16xf32, #tpu.memory_space<vmem>>) attributes {dimension_semantics = [#tpu.dimension_semantics<parallel>], iteration_bounds = array<i64: 1>, scalar_prefetch = 0 : i64, scratch_operands = 0 : i64, tpu.core_type = #tpu.core_type<tc>, window_params = [{transform_indices = @transform_0, window_bounds = array<i64: 16, 8>}, {pipeline_mode = #tpu.pipeline_mode<synchronous>, transform_indices = @transform_1, window_bounds = array<i64: 8, 16>}, {transform_indices = @transform_2, window_bounds = array<i64: 16, 16>}]} {
    %c0 = arith.constant 0 : index
    %c0_0 = arith.constant 0 : index
    %0 = vector.load %arg1[%c0, %c0_0] : memref<16x8xf32, #tpu.memory_space<vmem>>, vector<16x8xf32>
    %c0_1 = arith.constant 0 : index
    %c0_2 = arith.constant 0 : index
    %1 = vector.load %arg2[%c0_1, %c0_2] : memref<8x16xf32, #tpu.memory_space<vmem>>, vector<8x16xf32>
    %cst = arith.constant dense<0.000000e+00> : vector<16x16xf32>
    %2 = tpu.matmul %0, %1, %cst {dimension_numbers = #tpu.dot_dimension_numbers<[1], [0], [0], [1], [0, 0, 1, 1], [], []>} : vector<16x8xf32>, vector<8x16xf32>, vector<16x16xf32> -> vector<16x16xf32>
    %c0_3 = arith.constant 0 : index
    %c0_4 = arith.constant 0 : index
    %3 = vector.load %arg3[%c0_3, %c0_4] : memref<16x16xf32, #tpu.memory_space<vmem>>, vector<16x16xf32>
    tpu.vector_store %arg3[%c0_3, %c0_4], %2 {strides = array<i32>} : memref<16x16xf32, #tpu.memory_space<vmem>>, vector<16x16xf32>,
    return
  }
  func.func @transform_0(%arg0: i32) -> (i32, i32) {
    %c0_i32 = arith.constant 0 : i32
    %c0_i32_0 = arith.constant 0 : i32
    return %arg0, %c0_i32 : i32, i32
  }
  func.func @transform_1(%arg0: i32) -> (i32, i32) {
    %c0_i32 = arith.constant 0 : i32
    %c0_i32_0 = arith.constant 0 : i32
    %c0_i32_1 = arith.constant 0 : i32
    return %c0_i32, %c0_i32_0 : i32, i32
  }
  func.func @transform_2(%arg0: i32) -> (i32, i32) {
    %c0_i32 = arith.constant 0 : i32
    %c0_i32_0 = arith.constant 0 : i32
    return %arg0, %c0_i32 : i32, i32
  }
}

</mosaic_0001>

<bundles_post_ra>
// kernel: tpu_custom_call.1
= control target key start
LH: loop header
LB: loop body
LE: loop exit
PB: predicated region body
PF: predicated region fallthrough
CT: control target
= control target key end

     0   :  { %vm15_vm0 = vcmask 64512   ;;  %s128_s0 = inlined_call_operand.vmem [shape: f32[16,8], index: 0, kind: input, shape index: {}]   ;;  %s129_s1 = inlined_call_operand.vmem [shape: f32[8,16], index: 1, kind: input, shape index: {}]   ;;  %s130_s2 = inlined_call_operand.hbm [shape: f32[16,16], index: 2, kind: output, shape index: {}]  }
   0x1   :  { %v14_v0 = vld [vmem:[%s129_s1] sm:$0xff]  ;;  %v13_v2 = vld [vmem:[%s128_s0 + $0x8] sm:$0xff] }
   0x2   :  { %v12_v1 = vld [vmem:[%s128_s0] sm:$0xff]  ;;  %37 = vmatpush.msra.mxu0 %v14_v0  ;;  %68 = vmatpush.msra.mxu1 %v14_v0 }
   0x3   :  { %7 = vsyncpa [#allocation3], 0  ;;  %66 = vmatmul.msk.f32.vlgmr.msra.gmra.mxu0 %vm15_vm0, %v12_v1  ;;  %67 = vmatmul.msk.f32.vlgmr.msra.gmra.mxu1 %vm15_vm0, %v13_v2  ;;  %s98_s15 = smov [#allocation2]   ;;  %s54_s1 = sshll.u32 %s130_s2, 4  ;;  %vm45_vm1 = vcmask 130048   ;;  %s55_s1 = int_to_ptr.hbm [resolvable:$true] %s54_s1 }
   0x4   :  { %s52_s16 = sshll.u32 %s98_s15, 4  ;;  %s99_s19 = smov 128   ;;  %s53_s16 = int_to_ptr.vmem [resolvable:$true] %s52_s16 }
   0x5   :  { %s100_s0 = smov 8  }
  0x80   :  { %v39_v3 = vpop.f32.mrf.mxu0  ;;  %v42_v4 = vpop.f32.mrf.mxu1 }
  0x81   :  { %46 = vst.msk [vmem:[#allocation2] sm:$0xff] %vm45_vm1, %v39_v3 }
  0x82   :  { %47 = vst.msk [vmem:[#allocation2 + $0x8] sm:$0xff] %vm45_vm1, %v42_v4 }
  0x83   :  { %60 = dma.vmem_to_hbm [thread:$0]  %s53_s16, 256, %s55_s1, [#allocation3], %s99_s19, %s99_s19, %s100_s0  }
  0x84   :  { %96 = dma.done.wait [#allocation3], 256  }
  0x85   :  { %97 = vsyncadd [#allocation3], 4294967040 }
  0x86   :  { %65 = vsyncpa [#allocation3], 1 }

</bundles_post_ra>
